<compile_context>
chip_gen: v5e
topology: v5e:2x2
jax: 0.10.0
libtpu: 0.0.40
codegen_flags: <defaults>
</compile_context>

<pallas_src>
import math
import functools

import jax
import jax.numpy as jnp
import numpy as np
from jax import lax
from jax.experimental import pallas as pl
from jax.experimental.pallas import tpu as pltpu


# ---------------------------------------------------------------------------
# Fused multi-head attention kernel
# ---------------------------------------------------------------------------

def _fused_mha_kernel(xq_ref, xk_ref, xv_ref,
                      wq_ref, wk_ref, wv_ref, wo_ref,
                      bq_ref, bk_ref, bv_ref, bo_ref,
                      o_ref,
                      k_scratch, v_scratch, ctx_scratch,
                      *, heads, d_k, scale):
    """One grid step = (batch b, query tile qi).

    xq: (1, tq, D)   xk, xv: (1, S, D)   w*: (D, D) bf16   b*: (1, D) f32
    k_scratch/v_scratch: (S, D) bf16 persistent across query tiles of a batch.
    """
    qi = pl.program_id(1)

    # --- K/V projections: once per batch, cached in VMEM scratch -------------
    @pl.when(qi == 0)
    def _():
        xk = xk_ref[0].astype(jnp.bfloat16)                              # (S, D)
        xv = xv_ref[0].astype(jnp.bfloat16)                              # (S, D)
        k = jnp.dot(xk, wk_ref[...], preferred_element_type=jnp.float32) + bk_ref[...]
        v = jnp.dot(xv, wv_ref[...], preferred_element_type=jnp.float32) + bv_ref[...]
        k_scratch[...] = k.astype(jnp.bfloat16)
        v_scratch[...] = v.astype(jnp.bfloat16)

    # --- Q projection for this query tile (scale folded into q) --------------
    xq = xq_ref[0].astype(jnp.bfloat16)                                  # (tq, D)
    q = jnp.dot(xq, wq_ref[...], preferred_element_type=jnp.float32) + bq_ref[...]
    q = (q * scale).astype(jnp.bfloat16)                                 # (tq, D)

    k = k_scratch[...]                                                   # (S, D) bf16
    v = v_scratch[...]                                                   # (S, D) bf16

    # --- per-head scaled dot-product attention --------------------------------
    # Contract the last dim of q_h and k_h directly (no materialized k.T);
    # scores keep S on the lane axis (lane-dense).
    dn = (((1,), (1,)), ((), ()))      # contracting dims, batch dims
    for h in range(heads):             # unrolled: all heads handled per grid step
        sl = slice(h * d_k, (h + 1) * d_k)
        q_h = q[:, sl]                 # (tq, d_k) bf16
        k_h = k[:, sl]                 # (S,  d_k) bf16
        v_h = v[:, sl]                 # (S,  d_k) bf16

        s = lax.dot_general(q_h, k_h, dn,
                            preferred_element_type=jnp.float32)          # (tq, S) f32
        s = s - jnp.max(s, axis=-1, keepdims=True)
        p = jnp.exp(s)                                                   # unnormalized
        denom = jnp.sum(p, axis=-1, keepdims=True)                       # (tq, 1)
        o_h = jnp.dot(p.astype(jnp.bfloat16), v_h,
                      preferred_element_type=jnp.float32)                # (tq, d_k)
        # normalize AFTER the PV matmul (d_k multiplies instead of S divides)
        ctx_scratch[:, sl] = o_h * pl.reciprocal(denom, approx=True)
    # TODO(synk): padded edge query tiles (S % tq != 0) would run exp() on
    #   garbage rows (masked on store, outputs still correct) — mask if needed.

    # --- output projection (single full-D contraction) -----------------------
    ctx = ctx_scratch[...].astype(jnp.bfloat16)                          # (tq, D)
    out = jnp.dot(ctx, wo_ref[...], preferred_element_type=jnp.float32) + bo_ref[...]
    o_ref[0] = out.astype(o_ref.dtype)


# ---------------------------------------------------------------------------
# Wrapper
# ---------------------------------------------------------------------------

def fused_mha(xq, xk, xv, wq, wk, wv, wo, bq, bk, bv, bo, *, heads, max_q_tile=128):
    """Fused MHA forward.  x*: (B, S, D); w*: (D_in, D_out) pre-transposed; b*: (D,)."""
    B, S, D = xq.shape
    assert D % heads == 0
    d_k = D // heads
    scale = 1.0 / math.sqrt(d_k)

    # Query tile: whole sequence if small, otherwise sublane-aligned tiles.
    tq = S if S <= max_q_tile else max_q_tile
    n_qt = pl.cdiv(S, tq)

    # MXU operands in bf16; biases stay f32 (added to f32 accumulators).
    wq_b, wk_b, wv_b, wo_b = (w.astype(jnp.bfloat16) for w in (wq, wk, wv, wo))
    b2 = lambda x: x.reshape(1, D).astype(jnp.float32)

    x_spec_q  = pl.BlockSpec((1, tq, D), lambda b, qi: (b, qi, 0))
    x_spec_kv = pl.BlockSpec((1, S, D),  lambda b, qi: (b, 0, 0))
    w_spec    = pl.BlockSpec((D, D),     lambda b, qi: (0, 0))
    bias_spec = pl.BlockSpec((1, D),     lambda b, qi: (0, 0))

    # Cost estimate: K/V projected once per batch (no per-tile redundancy).
    flops = int(2 * B * S * D * D            # Q projection
                + 2 * 2 * B * S * D * D      # K, V projections (once per batch)
                + 4 * B * S * S * D          # attention matmuls (QK^T + PV, all heads)
                + 2 * B * S * D * D)         # output projection
    cost = pl.CostEstimate(
        flops=flops,
        transcendentals=int(B * heads * S * S),                         # exp
        bytes_accessed=int(4 * 3 * B * S * D      # x inputs (f32)
                           + 2 * 4 * D * D        # weights (bf16)
                           + 4 * 4 * D            # biases (f32)
                           + 4 * B * S * D),      # output (f32)
    )

    # Explicit VMEM budget: inputs + weights (double-buffered) + scratch + slack.
    vmem_bytes = (
        2 * (tq * D * 4 + 2 * S * D * 4)     # xq tile + xk/xv blocks (f32, x2 buffers)
        + 2 * 4 * D * D * 2                  # 4 bf16 weight blocks (x2 buffers)
        + 2 * 4 * D * 4                      # biases
        + 2 * tq * D * 4                     # output tile (x2 buffers)
        + 2 * S * D * 2                      # K/V bf16 scratch
        + tq * D * 4                         # ctx scratch
        + 4 * tq * S * 4                     # score/prob working set (rough)
    )
    vmem_limit = int(min(max(2 * vmem_bytes, 32 * 1024 * 1024), 64 * 1024 * 1024))

    kernel = functools.partial(_fused_mha_kernel, heads=heads, d_k=d_k, scale=scale)
    return pl.pallas_call(
        kernel,
        out_shape=jax.ShapeDtypeStruct((B, S, D), xq.dtype),
        grid=(B, n_qt),
        in_specs=[x_spec_q, x_spec_kv, x_spec_kv,
                  w_spec, w_spec, w_spec, w_spec,
                  bias_spec, bias_spec, bias_spec, bias_spec],
        out_specs=pl.BlockSpec((1, tq, D), lambda b, qi: (b, qi, 0)),
        scratch_shapes=[
            pltpu.VMEM((S, D), jnp.bfloat16),    # projected K (per-batch cache)
            pltpu.VMEM((S, D), jnp.bfloat16),    # projected V (per-batch cache)
            pltpu.VMEM((tq, D), jnp.float32),    # merged per-head context
        ],
        compiler_params=pltpu.CompilerParams(
            # qi axis must be "arbitrary": tiles of one batch share the K/V cache.
            dimension_semantics=("parallel", "arbitrary"),
            vmem_limit_bytes=vmem_limit),
        cost_estimate=cost,
    )(xq, xk, xv, wq_b, wk_b, wv_b, wo_b, b2(bq), b2(bk), b2(bv), b2(bo))


class MultiHeadAttentionPallas:
    """Mirrors the PyTorch MultiHeadAttention forward (mask=None path)."""

    def __init__(self, heads, d_model, key):
        assert d_model % heads == 0
        self.heads = heads
        self.d_model = d_model
        self.d_k = d_model // heads

        ks = jax.random.split(key, 8)
        bound = 1.0 / math.sqrt(d_model)

        def init_linear(kw, kb):
            # weight stored pre-transposed: (D_in, D_out), so y = x @ W + b
            w = jax.random.uniform(kw, (d_model, d_model), jnp.float32,
                                   minval=-bound, maxval=bound)
            b = jax.random.uniform(kb, (d_model,), jnp.float32,
                                   minval=-bound, maxval=bound)
            return w, b

        self.wq, self.bq = init_linear(ks[0], ks[1])
        self.wk, self.bk = init_linear(ks[2], ks[3])
        self.wv, self.bv = init_linear(ks[4], ks[5])
        self.wo, self.bo = init_linear(ks[6], ks[7])

    def __call__(self, Q, K, V, max_q_tile=128):
        # TODO(synk): mask != None branch of the reference module is not implemented.
        return fused_mha(Q, K, V,
                         self.wq, self.wk, self.wv, self.wo,
                         self.bq, self.bk, self.bv, self.bo,
                         heads=self.heads, max_q_tile=max_q_tile)


# ---------------------------------------------------------------------------
# Pure-JAX reference (f32, for correctness check)
# ---------------------------------------------------------------------------

def reference_mha(mha, Q, K, V):
    B, S, D = Q.shape
    H, Dk = mha.heads, mha.d_k
    q = (Q @ mha.wq + mha.bq).reshape(B, S, H, Dk).transpose(0, 2, 1, 3)
    k = (K @ mha.wk + mha.bk).reshape(B, S, H, Dk).transpose(0, 2, 1, 3)
    v = (V @ mha.wv + mha.bv).reshape(B, S, H, Dk).transpose(0, 2, 1, 3)
    scores = jnp.einsum("bhqd,bhkd->bhqk", q, k) / math.sqrt(Dk)
    attn = jax.nn.softmax(scores, axis=-1)
    ctx = jnp.einsum("bhqk,bhkd->bhqd", attn, v)
    ctx = ctx.transpose(0, 2, 1, 3).reshape(B, S, D)
    return ctx @ mha.wo + mha.bo


# ---------------------------------------------------------------------------
# Main
# ---------------------------------------------------------------------------

if __name__ == "__main__":
    key = jax.random.PRNGKey(0)
    k_params, k_q, k_k, k_v = jax.random.split(key, 4)

    # batch, seq, d_model, heads (d_k = 8); max_q_tile=8 -> two query tiles,
    # which exercises the per-batch K/V cache reuse across tiles.
    B, S, D, H = 2, 16, 32, 4
    mha = MultiHeadAttentionPallas(heads=H, d_model=D, key=k_params)

    Q = jax.random.normal(k_q, (B, S, D), jnp.float32)
    K = jax.random.normal(k_k, (B, S, D), jnp.float32)
    V = jax.random.normal(k_v, (B, S, D), jnp.float32)

    out = jax.block_until_ready(mha(Q, K, V, max_q_tile=8))

    ref = reference_mha(mha, Q, K, V)
    # bf16 MXU operands + approx reciprocal => compare with bf16-level tolerance.
    np.testing.assert_allclose(np.asarray(out), np.asarray(ref),
                               rtol=5e-2, atol=5e-2)

    print("KERNEL_OK")
</pallas_src>

<mosaic_0001>
module attributes {stable_mosaic.version = 11 : i64} {
  func.func @_fused_mha_kernel(%arg0: i32, %arg1: i32, %arg2: memref<1x8x32xf32, #tpu.memory_space<vmem>>, %arg3: memref<1x16x32xf32, #tpu.memory_space<vmem>>, %arg4: memref<1x16x32xf32, #tpu.memory_space<vmem>>, %arg5: memref<32x32xbf16, #tpu.memory_space<vmem>>, %arg6: memref<32x32xbf16, #tpu.memory_space<vmem>>, %arg7: memref<32x32xbf16, #tpu.memory_space<vmem>>, %arg8: memref<32x32xbf16, #tpu.memory_space<vmem>>, %arg9: memref<1x32xf32, #tpu.memory_space<vmem>>, %arg10: memref<1x32xf32, #tpu.memory_space<vmem>>, %arg11: memref<1x32xf32, #tpu.memory_space<vmem>>, %arg12: memref<1x32xf32, #tpu.memory_space<vmem>>, %arg13: memref<1x8x32xf32, #tpu.memory_space<vmem>>, %arg14: memref<16x32xbf16, #tpu.memory_space<vmem>>, %arg15: memref<16x32xbf16, #tpu.memory_space<vmem>>, %arg16: memref<8x32xf32, #tpu.memory_space<vmem>>) attributes {dimension_semantics = [#tpu.dimension_semantics<parallel>, #tpu.dimension_semantics<arbitrary>], iteration_bounds = array<i64: 2, 2>, scalar_prefetch = 0 : i64, scratch_operands = 3 : i64, tpu.core_type = #tpu.core_type<tc>, window_params = [{transform_indices = @transform_0, window_bounds = array<i64: 1, 8, 32>}, {transform_indices = @transform_1, window_bounds = array<i64: 1, 16, 32>}, {transform_indices = @transform_2, window_bounds = array<i64: 1, 16, 32>}, {pipeline_mode = #tpu.pipeline_mode<synchronous>, transform_indices = @transform_3, window_bounds = array<i64: 32, 32>}, {pipeline_mode = #tpu.pipeline_mode<synchronous>, transform_indices = @transform_4, window_bounds = array<i64: 32, 32>}, {pipeline_mode = #tpu.pipeline_mode<synchronous>, transform_indices = @transform_5, window_bounds = array<i64: 32, 32>}, {pipeline_mode = #tpu.pipeline_mode<synchronous>, transform_indices = @transform_6, window_bounds = array<i64: 32, 32>}, {pipeline_mode = #tpu.pipeline_mode<synchronous>, transform_indices = @transform_7, window_bounds = array<i64: 1, 32>}, {pipeline_mode = #tpu.pipeline_mode<synchronous>, transform_indices = @transform_8, window_bounds = array<i64: 1, 32>}, {pipeline_mode = #tpu.pipeline_mode<synchronous>, transform_indices = @transform_9, window_bounds = array<i64: 1, 32>}, {pipeline_mode = #tpu.pipeline_mode<synchronous>, transform_indices = @transform_10, window_bounds = array<i64: 1, 32>}, {transform_indices = @transform_11, window_bounds = array<i64: 1, 8, 32>}]} {
    %c0_i32 = arith.constant 0 : i32
    %0 = arith.cmpi eq, %arg1, %c0_i32 : i32
    %1 = arith.extui %0 : i1 to i32
    %c0_i32_0 = arith.constant 0 : i32
    %2 = arith.cmpi ne, %1, %c0_i32_0 : i32
    scf.if %2 {
      %c0_43 = arith.constant 0 : index
      %c0_44 = arith.constant 0 : index
      %c0_45 = arith.constant 0 : index
      %94 = vector.load %arg3[%c0_43, %c0_44, %c0_45] : memref<1x16x32xf32, #tpu.memory_space<vmem>>, vector<1x16x32xf32>
      %95 = vector.shape_cast %94 : vector<1x16x32xf32> to vector<16x32xf32>
      %96 = arith.truncf %95 : vector<16x32xf32> to vector<16x32xbf16>
      %c0_46 = arith.constant 0 : index
      %c0_47 = arith.constant 0 : index
      %c0_48 = arith.constant 0 : index
      %97 = vector.load %arg4[%c0_46, %c0_47, %c0_48] : memref<1x16x32xf32, #tpu.memory_space<vmem>>, vector<1x16x32xf32>
      %98 = vector.shape_cast %97 : vector<1x16x32xf32> to vector<16x32xf32>
      %99 = arith.truncf %98 : vector<16x32xf32> to vector<16x32xbf16>
      %c0_49 = arith.constant 0 : index
      %c0_50 = arith.constant 0 : index
      %100 = vector.load %arg6[%c0_49, %c0_50] : memref<32x32xbf16, #tpu.memory_space<vmem>>, vector<32x32xbf16>
      %cst_51 = arith.constant dense<0.000000e+00> : vector<16x32xf32>
      %101 = tpu.matmul %96, %100, %cst_51 {dimension_numbers = #tpu.dot_dimension_numbers<[1], [0], [0], [1], [0, 0, 1, 1], [], []>} : vector<16x32xbf16>, vector<32x32xbf16>, vector<16x32xf32> -> vector<16x32xf32>
      %c0_52 = arith.constant 0 : index
      %c0_53 = arith.constant 0 : index
      %102 = vector.load %arg10[%c0_52, %c0_53] : memref<1x32xf32, #tpu.memory_space<vmem>>, vector<1x32xf32>
      %103 = vector.broadcast %102 : vector<1x32xf32> to vector<16x32xf32>
      %104 = arith.addf %101, %103 : vector<16x32xf32>
      %c0_54 = arith.constant 0 : index
      %c0_55 = arith.constant 0 : index
      %105 = vector.load %arg7[%c0_54, %c0_55] : memref<32x32xbf16, #tpu.memory_space<vmem>>, vector<32x32xbf16>
      %cst_56 = arith.constant dense<0.000000e+00> : vector<16x32xf32>
      %106 = tpu.matmul %99, %105, %cst_56 {dimension_numbers = #tpu.dot_dimension_numbers<[1], [0], [0], [1], [0, 0, 1, 1], [], []>} : vector<16x32xbf16>, vector<32x32xbf16>, vector<16x32xf32> -> vector<16x32xf32>
      %c0_57 = arith.constant 0 : index
      %c0_58 = arith.constant 0 : index
      %107 = vector.load %arg11[%c0_57, %c0_58] : memref<1x32xf32, #tpu.memory_space<vmem>>, vector<1x32xf32>
      %108 = vector.broadcast %107 : vector<1x32xf32> to vector<16x32xf32>
      %109 = arith.addf %106, %108 : vector<16x32xf32>
      %110 = arith.truncf %104 : vector<16x32xf32> to vector<16x32xbf16>
      %c0_59 = arith.constant 0 : index
      %c0_60 = arith.constant 0 : index
      %111 = vector.load %arg14[%c0_59, %c0_60] : memref<16x32xbf16, #tpu.memory_space<vmem>>, vector<16x32xbf16>
      tpu.vector_store %arg14[%c0_59, %c0_60], %110 {strides = array<i32>} : memref<16x32xbf16, #tpu.memory_space<vmem>>, vector<16x32xbf16>,
      %112 = arith.truncf %109 : vector<16x32xf32> to vector<16x32xbf16>
      %c0_61 = arith.constant 0 : index
      %c0_62 = arith.constant 0 : index
      %113 = vector.load %arg15[%c0_61, %c0_62] : memref<16x32xbf16, #tpu.memory_space<vmem>>, vector<16x32xbf16>
      tpu.vector_store %arg15[%c0_61, %c0_62], %112 {strides = array<i32>} : memref<16x32xbf16, #tpu.memory_space<vmem>>, vector<16x32xbf16>,
    } else {
    }
    %c0 = arith.constant 0 : index
    %c0_1 = arith.constant 0 : index
    %c0_2 = arith.constant 0 : index
    %3 = vector.load %arg2[%c0, %c0_1, %c0_2] : memref<1x8x32xf32, #tpu.memory_space<vmem>>, vector<1x8x32xf32>
    %4 = vector.shape_cast %3 : vector<1x8x32xf32> to vector<8x32xf32>
    %5 = arith.truncf %4 : vector<8x32xf32> to vector<8x32xbf16>
    %c0_3 = arith.constant 0 : index
    %c0_4 = arith.constant 0 : index
    %6 = vector.load %arg5[%c0_3, %c0_4] : memref<32x32xbf16, #tpu.memory_space<vmem>>, vector<32x32xbf16>
    %cst = arith.constant dense<0.000000e+00> : vector<8x32xf32>
    %7 = tpu.matmul %5, %6, %cst {dimension_numbers = #tpu.dot_dimension_numbers<[1], [0], [0], [1], [0, 0, 1, 1], [], []>} : vector<8x32xbf16>, vector<32x32xbf16>, vector<8x32xf32> -> vector<8x32xf32>
    %c0_5 = arith.constant 0 : index
    %c0_6 = arith.constant 0 : index
    %8 = vector.load %arg9[%c0_5, %c0_6] : memref<1x32xf32, #tpu.memory_space<vmem>>, vector<1x32xf32>
    %9 = vector.broadcast %8 : vector<1x32xf32> to vector<8x32xf32>
    %10 = arith.addf %7, %9 : vector<8x32xf32>
    %cst_7 = arith.constant 0.353553385 : f32
    %11 = vector.broadcast %cst_7 : f32 to vector<8x32xf32>
    %12 = arith.mulf %10, %11 : vector<8x32xf32>
    %13 = arith.truncf %12 : vector<8x32xf32> to vector<8x32xbf16>
    %c0_8 = arith.constant 0 : index
    %c0_9 = arith.constant 0 : index
    %14 = vector.load %arg14[%c0_8, %c0_9] : memref<16x32xbf16, #tpu.memory_space<vmem>>, vector<16x32xbf16>
    %c0_10 = arith.constant 0 : index
    %c0_11 = arith.constant 0 : index
    %15 = vector.load %arg15[%c0_10, %c0_11] : memref<16x32xbf16, #tpu.memory_space<vmem>>, vector<16x32xbf16>
    %16 = vector.extract_strided_slice %13 {offsets = [0, 0], sizes = [8, 8], strides = [1, 1]} : vector<8x32xbf16> to vector<8x8xbf16>
    %17 = vector.extract_strided_slice %14 {offsets = [0, 0], sizes = [16, 8], strides = [1, 1]} : vector<16x32xbf16> to vector<16x8xbf16>
    %18 = vector.extract_strided_slice %15 {offsets = [0, 0], sizes = [16, 8], strides = [1, 1]} : vector<16x32xbf16> to vector<16x8xbf16>
    %cst_12 = arith.constant dense<0.000000e+00> : vector<8x16xf32>
    %19 = tpu.matmul %16, %17, %cst_12 {dimension_numbers = #tpu.dot_dimension_numbers<[1], [1], [0], [0], [0, 0, 1, 0], [], []>} : vector<8x8xbf16>, vector<16x8xbf16>, vector<8x16xf32> -> vector<8x16xf32>
    %cst_13 = arith.constant dense<0xFF800000> : vector<8xf32>
    %20 = vector.multi_reduction <maximumf>, %19, %cst_13 [1] : vector<8x16xf32> to vector<8xf32>
    %21 = vector.shape_cast %20 : vector<8xf32> to vector<8x1xf32>
    %22 = vector.broadcast %21 : vector<8x1xf32> to vector<8x16xf32>
    %23 = arith.subf %19, %22 : vector<8x16xf32>
    %24 = math.exp %23 : vector<8x16xf32>
    %cst_14 = arith.constant dense<0.000000e+00> : vector<8xf32>
    %25 = vector.multi_reduction <add>, %24, %cst_14 [1] : vector<8x16xf32> to vector<8xf32>
    %26 = vector.shape_cast %25 : vector<8xf32> to vector<8x1xf32>
    %27 = arith.truncf %24 : vector<8x16xf32> to vector<8x16xbf16>
    %cst_15 = arith.constant dense<0.000000e+00> : vector<8x8xf32>
    %28 = tpu.matmul %27, %18, %cst_15 {dimension_numbers = #tpu.dot_dimension_numbers<[1], [0], [0], [1], [0, 0, 1, 1], [], []>} : vector<8x16xbf16>, vector<16x8xbf16>, vector<8x8xf32> -> vector<8x8xf32>
    %29 = tpu.reciprocal %26 {approx = true} : vector<8x1xf32> -> vector<8x1xf32>
    %30 = vector.broadcast %29 : vector<8x1xf32> to vector<8x8xf32>
    %31 = arith.mulf %28, %30 : vector<8x8xf32>
    %c0_16 = arith.constant 0 : index
    %c0_17 = arith.constant 0 : index
    %32 = vector.load %arg16[%c0_16, %c0_17] : memref<8x32xf32, #tpu.memory_space<vmem>>, vector<8x8xf32>
    tpu.vector_store %arg16[%c0_16, %c0_17], %31 {strides = array<i32>} : memref<8x32xf32, #tpu.memory_space<vmem>>, vector<8x8xf32>,
    %33 = vector.extract_strided_slice %13 {offsets = [0, 8], sizes = [8, 8], strides = [1, 1]} : vector<8x32xbf16> to vector<8x8xbf16>
    %34 = vector.extract_strided_slice %14 {offsets = [0, 8], sizes = [16, 8], strides = [1, 1]} : vector<16x32xbf16> to vector<16x8xbf16>
    %35 = vector.extract_strided_slice %15 {offsets = [0, 8], sizes = [16, 8], strides = [1, 1]} : vector<16x32xbf16> to vector<16x8xbf16>
    %cst_18 = arith.constant dense<0.000000e+00> : vector<8x16xf32>
    %36 = tpu.matmul %33, %34, %cst_18 {dimension_numbers = #tpu.dot_dimension_numbers<[1], [1], [0], [0], [0, 0, 1, 0], [], []>} : vector<8x8xbf16>, vector<16x8xbf16>, vector<8x16xf32> -> vector<8x16xf32>
    %cst_19 = arith.constant dense<0xFF800000> : vector<8xf32>
    %37 = vector.multi_reduction <maximumf>, %36, %cst_19 [1] : vector<8x16xf32> to vector<8xf32>
    %38 = vector.shape_cast %37 : vector<8xf32> to vector<8x1xf32>
    %39 = vector.broadcast %38 : vector<8x1xf32> to vector<8x16xf32>
    %40 = arith.subf %36, %39 : vector<8x16xf32>
    %41 = math.exp %40 : vector<8x16xf32>
    %cst_20 = arith.constant dense<0.000000e+00> : vector<8xf32>
    %42 = vector.multi_reduction <add>, %41, %cst_20 [1] : vector<8x16xf32> to vector<8xf32>
    %43 = vector.shape_cast %42 : vector<8xf32> to vector<8x1xf32>
    %44 = arith.truncf %41 : vector<8x16xf32> to vector<8x16xbf16>
    %cst_21 = arith.constant dense<0.000000e+00> : vector<8x8xf32>
    %45 = tpu.matmul %44, %35, %cst_21 {dimension_numbers = #tpu.dot_dimension_numbers<[1], [0], [0], [1], [0, 0, 1, 1], [], []>} : vector<8x16xbf16>, vector<16x8xbf16>, vector<8x8xf32> -> vector<8x8xf32>
    %46 = tpu.reciprocal %43 {approx = true} : vector<8x1xf32> -> vector<8x1xf32>
    %47 = vector.broadcast %46 : vector<8x1xf32> to vector<8x8xf32>
    %48 = arith.mulf %45, %47 : vector<8x8xf32>
    %c0_22 = arith.constant 0 : index
    %c8 = arith.constant 8 : index
    %49 = vector.load %arg16[%c0_22, %c8] : memref<8x32xf32, #tpu.memory_space<vmem>>, vector<8x8xf32>
    tpu.vector_store %arg16[%c0_22, %c8], %48 {strides = array<i32>} : memref<8x32xf32, #tpu.memory_space<vmem>>, vector<8x8xf32>,
    %50 = vector.extract_strided_slice %13 {offsets = [0, 16], sizes = [8, 8], strides = [1, 1]} : vector<8x32xbf16> to vector<8x8xbf16>
    %51 = vector.extract_strided_slice %14 {offsets = [0, 16], sizes = [16, 8], strides = [1, 1]} : vector<16x32xbf16> to vector<16x8xbf16>
    %52 = vector.extract_strided_slice %15 {offsets = [0, 16], sizes = [16, 8], strides = [1, 1]} : vector<16x32xbf16> to vector<16x8xbf16>
    %cst_23 = arith.constant dense<0.000000e+00> : vector<8x16xf32>
    %53 = tpu.matmul %50, %51, %cst_23 {dimension_numbers = #tpu.dot_dimension_numbers<[1], [1], [0], [0], [0, 0, 1, 0], [], []>} : vector<8x8xbf16>, vector<16x8xbf16>, vector<8x16xf32> -> vector<8x16xf32>
    %cst_24 = arith.constant dense<0xFF800000> : vector<8xf32>
    %54 = vector.multi_reduction <maximumf>, %53, %cst_24 [1] : vector<8x16xf32> to vector<8xf32>
    %55 = vector.shape_cast %54 : vector<8xf32> to vector<8x1xf32>
    %56 = vector.broadcast %55 : vector<8x1xf32> to vector<8x16xf32>
    %57 = arith.subf %53, %56 : vector<8x16xf32>
    %58 = math.exp %57 : vector<8x16xf32>
    %cst_25 = arith.constant dense<0.000000e+00> : vector<8xf32>
    %59 = vector.multi_reduction <add>, %58, %cst_25 [1] : vector<8x16xf32> to vector<8xf32>
    %60 = vector.shape_cast %59 : vector<8xf32> to vector<8x1xf32>
    %61 = arith.truncf %58 : vector<8x16xf32> to vector<8x16xbf16>
    %cst_26 = arith.constant dense<0.000000e+00> : vector<8x8xf32>
    %62 = tpu.matmul %61, %52, %cst_26 {dimension_numbers = #tpu.dot_dimension_numbers<[1], [0], [0], [1], [0, 0, 1, 1], [], []>} : vector<8x16xbf16>, vector<16x8xbf16>, vector<8x8xf32> -> vector<8x8xf32>
    %63 = tpu.reciprocal %60 {approx = true} : vector<8x1xf32> -> vector<8x1xf32>
    %64 = vector.broadcast %63 : vector<8x1xf32> to vector<8x8xf32>
    %65 = arith.mulf %62, %64 : vector<8x8xf32>
    %c0_27 = arith.constant 0 : index
    %c16 = arith.constant 16 : index
    %66 = vector.load %arg16[%c0_27, %c16] : memref<8x32xf32, #tpu.memory_space<vmem>>, vector<8x8xf32>
    tpu.vector_store %arg16[%c0_27, %c16], %65 {strides = array<i32>} : memref<8x32xf32, #tpu.memory_space<vmem>>, vector<8x8xf32>,
    %67 = vector.extract_strided_slice %13 {offsets = [0, 24], sizes = [8, 8], strides = [1, 1]} : vector<8x32xbf16> to vector<8x8xbf16>
    %68 = vector.extract_strided_slice %14 {offsets = [0, 24], sizes = [16, 8], strides = [1, 1]} : vector<16x32xbf16> to vector<16x8xbf16>
    %69 = vector.extract_strided_slice %15 {offsets = [0, 24], sizes = [16, 8], strides = [1, 1]} : vector<16x32xbf16> to vector<16x8xbf16>
    %cst_28 = arith.constant dense<0.000000e+00> : vector<8x16xf32>
    %70 = tpu.matmul %67, %68, %cst_28 {dimension_numbers = #tpu.dot_dimension_numbers<[1], [1], [0], [0], [0, 0, 1, 0], [], []>} : vector<8x8xbf16>, vector<16x8xbf16>, vector<8x16xf32> -> vector<8x16xf32>
    %cst_29 = arith.constant dense<0xFF800000> : vector<8xf32>
    %71 = vector.multi_reduction <maximumf>, %70, %cst_29 [1] : vector<8x16xf32> to vector<8xf32>
    %72 = vector.shape_cast %71 : vector<8xf32> to vector<8x1xf32>
    %73 = vector.broadcast %72 : vector<8x1xf32> to vector<8x16xf32>
    %74 = arith.subf %70, %73 : vector<8x16xf32>
    %75 = math.exp %74 : vector<8x16xf32>
    %cst_30 = arith.constant dense<0.000000e+00> : vector<8xf32>
    %76 = vector.multi_reduction <add>, %75, %cst_30 [1] : vector<8x16xf32> to vector<8xf32>
    %77 = vector.shape_cast %76 : vector<8xf32> to vector<8x1xf32>
    %78 = arith.truncf %75 : vector<8x16xf32> to vector<8x16xbf16>
    %cst_31 = arith.constant dense<0.000000e+00> : vector<8x8xf32>
    %79 = tpu.matmul %78, %69, %cst_31 {dimension_numbers = #tpu.dot_dimension_numbers<[1], [0], [0], [1], [0, 0, 1, 1], [], []>} : vector<8x16xbf16>, vector<16x8xbf16>, vector<8x8xf32> -> vector<8x8xf32>
    %80 = tpu.reciprocal %77 {approx = true} : vector<8x1xf32> -> vector<8x1xf32>
    %81 = vector.broadcast %80 : vector<8x1xf32> to vector<8x8xf32>
    %82 = arith.mulf %79, %81 : vector<8x8xf32>
    %c0_32 = arith.constant 0 : index
    %c24 = arith.constant 24 : index
    %83 = vector.load %arg16[%c0_32, %c24] : memref<8x32xf32, #tpu.memory_space<vmem>>, vector<8x8xf32>
    tpu.vector_store %arg16[%c0_32, %c24], %82 {strides = array<i32>} : memref<8x32xf32, #tpu.memory_space<vmem>>, vector<8x8xf32>,
    %c0_33 = arith.constant 0 : index
    %c0_34 = arith.constant 0 : index
    %84 = vector.load %arg16[%c0_33, %c0_34] : memref<8x32xf32, #tpu.memory_space<vmem>>, vector<8x32xf32>
    %85 = arith.truncf %84 : vector<8x32xf32> to vector<8x32xbf16>
    %c0_35 = arith.constant 0 : index
    %c0_36 = arith.constant 0 : index
    %86 = vector.load %arg8[%c0_35, %c0_36] : memref<32x32xbf16, #tpu.memory_space<vmem>>, vector<32x32xbf16>
    %cst_37 = arith.constant dense<0.000000e+00> : vector<8x32xf32>
    %87 = tpu.matmul %85, %86, %cst_37 {dimension_numbers = #tpu.dot_dimension_numbers<[1], [0], [0], [1], [0, 0, 1, 1], [], []>} : vector<8x32xbf16>, vector<32x32xbf16>, vector<8x32xf32> -> vector<8x32xf32>
    %c0_38 = arith.constant 0 : index
    %c0_39 = arith.constant 0 : index
    %88 = vector.load %arg12[%c0_38, %c0_39] : memref<1x32xf32, #tpu.memory_space<vmem>>, vector<1x32xf32>
    %89 = vector.broadcast %88 : vector<1x32xf32> to vector<8x32xf32>
    %90 = arith.addf %87, %89 : vector<8x32xf32>
    %c0_40 = arith.constant 0 : index
    %c0_41 = arith.constant 0 : index
    %c0_42 = arith.constant 0 : index
    %91 = vector.load %arg13[%c0_40, %c0_41, %c0_42] : memref<1x8x32xf32, #tpu.memory_space<vmem>>, vector<1x8x32xf32>
    %92 = vector.shape_cast %91 : vector<1x8x32xf32> to vector<8x32xf32>
    %93 = vector.shape_cast %90 : vector<8x32xf32> to vector<1x8x32xf32>
    tpu.vector_store %arg13[%c0_40, %c0_41, %c0_42], %93 {strides = array<i32>} : memref<1x8x32xf32, #tpu.memory_space<vmem>>, vector<1x8x32xf32>,
    return
  }
  func.func @transform_0(%arg0: i32, %arg1: i32) -> (i32, i32, i32) {
    %c0_i32 = arith.constant 0 : i32
    %c0_i32_0 = arith.constant 0 : i32
    return %arg0, %arg1, %c0_i32 : i32, i32, i32
  }
  func.func @transform_1(%arg0: i32, %arg1: i32) -> (i32, i32, i32) {
    %c0_i32 = arith.constant 0 : i32
    %c0_i32_0 = arith.constant 0 : i32
    %c0_i32_1 = arith.constant 0 : i32
    return %arg0, %c0_i32, %c0_i32_0 : i32, i32, i32
  }
  func.func @transform_2(%arg0: i32, %arg1: i32) -> (i32, i32, i32) {
    %c0_i32 = arith.constant 0 : i32
    %c0_i32_0 = arith.constant 0 : i32
    %c0_i32_1 = arith.constant 0 : i32
    return %arg0, %c0_i32, %c0_i32_0 : i32, i32, i32
  }
  func.func @transform_3(%arg0: i32, %arg1: i32) -> (i32, i32) {
    %c0_i32 = arith.constant 0 : i32
    %c0_i32_0 = arith.constant 0 : i32
    %c0_i32_1 = arith.constant 0 : i32
    return %c0_i32, %c0_i32_0 : i32, i32
  }
  func.func @transform_4(%arg0: i32, %arg1: i32) -> (i32, i32) {
    %c0_i32 = arith.constant 0 : i32
    %c0_i32_0 = arith.constant 0 : i32
    %c0_i32_1 = arith.constant 0 : i32
    return %c0_i32, %c0_i32_0 : i32, i32
  }
  func.func @transform_5(%arg0: i32, %arg1: i32) -> (i32, i32) {
    %c0_i32 = arith.constant 0 : i32
    %c0_i32_0 = arith.constant 0 : i32
    %c0_i32_1 = arith.constant 0 : i32
    return %c0_i32, %c0_i32_0 : i32, i32
  }
  func.func @transform_6(%arg0: i32, %arg1: i32) -> (i32, i32) {
    %c0_i32 = arith.constant 0 : i32
    %c0_i32_0 = arith.constant 0 : i32
    %c0_i32_1 = arith.constant 0 : i32
    return %c0_i32, %c0_i32_0 : i32, i32
  }
  func.func @transform_7(%arg0: i32, %arg1: i32) -> (i32, i32) {
    %c0_i32 = arith.constant 0 : i32
    %c0_i32_0 = arith.constant 0 : i32
    %c0_i32_1 = arith.constant 0 : i32
    return %c0_i32, %c0_i32_0 : i32, i32
  }
  func.func @transform_8(%arg0: i32, %arg1: i32) -> (i32, i32) {
    %c0_i32 = arith.constant 0 : i32
    %c0_i32_0 = arith.constant 0 : i32
    %c0_i32_1 = arith.constant 0 : i32
    return %c0_i32, %c0_i32_0 : i32, i32
  }
  func.func @transform_9(%arg0: i32, %arg1: i32) -> (i32, i32) {
    %c0_i32 = arith.constant 0 : i32
    %c0_i32_0 = arith.constant 0 : i32
    %c0_i32_1 = arith.constant 0 : i32
    return %c0_i32, %c0_i32_0 : i32, i32
  }
  func.func @transform_10(%arg0: i32, %arg1: i32) -> (i32, i32) {
    %c0_i32 = arith.constant 0 : i32
    %c0_i32_0 = arith.constant 0 : i32
    %c0_i32_1 = arith.constant 0 : i32
    return %c0_i32, %c0_i32_0 : i32, i32
  }
  func.func @transform_11(%arg0: i32, %arg1: i32) -> (i32, i32, i32) {
    %c0_i32 = arith.constant 0 : i32
    %c0_i32_0 = arith.constant 0 : i32
    return %arg0, %arg1, %c0_i32 : i32, i32, i32
  }
}

</mosaic_0001>

<bundles_post_ra>
// kernel: tpu_custom_call.1
= control target key start
LH: loop header
LB: loop body
LE: loop exit
PB: predicated region body
PF: predicated region fallthrough
CT: control target
= control target key end

     0   :  { %s2217_s0 = inlined_call_operand.hbm [shape: f32[2,16,32], index: 0, kind: input, shape index: {}]   ;;  %s2218_s1 = inlined_call_operand.hbm [shape: f32[2,16,32], index: 1, kind: input, shape index: {}]   ;;  %s2219_s2 = inlined_call_operand.hbm [shape: f32[2,16,32], index: 2, kind: input, shape index: {}]   ;;  %s2220_s3 = inlined_call_operand.hbm [shape: bf16[32,32], index: 3, kind: input, shape index: {}]   ;;  %s2221_s4 = inlined_call_operand.hbm [shape: bf16[32,32], index: 4, kind: input, shape index: {}]   ;;  %s2222_s5 = inlined_call_operand.hbm [shape: bf16[32,32], index: 5, kind: input, shape index: {}]   ;;  %s2223_s6 = inlined_call_operand.hbm [shape: bf16[32,32], index: 6, kind: input, shape index: {}]   ;;  %s2224_s7 = inlined_call_operand.vmem [shape: f32[1,32], index: 7, kind: input, shape index: {}]   ;;  %s2225_s8 = inlined_call_operand.vmem [shape: f32[1,32], index: 8, kind: input, shape index: {}]   ;;  %s2226_s9 = inlined_call_operand.vmem [shape: f32[1,32], index: 9, kind: input, shape index: {}]   ;;  %s2227_s10 = inlined_call_operand.vmem [shape: f32[1,32], index: 10, kind: input, shape index: {}]   ;;  %s2228_s11 = inlined_call_operand.hbm [shape: f32[2,16,32], index: 11, kind: output, shape index: {}]  }
   0x1   :  { %2246 = sst [smem:[#allocation32_spill]] %s2218_s1 }
   0x2   :  { %2247 = sst [smem:[#allocation33_spill]] %s2219_s2 }
   0x3   :  { %2248 = sst [smem:[#allocation34_spill]] %s2220_s3 }
   0x4   :  { %2249 = sst [smem:[#allocation35_spill]] %s2221_s4 }
   0x5   :  { %2250 = sst [smem:[#allocation36_spill]] %s2222_s5 }
   0x6   :  { %2251 = sst [smem:[#allocation37_spill]] %s2223_s6 }
   0x7   :  { %2252 = sst [smem:[#allocation38_spill]] %s2224_s7 }
   0x8   :  { %2253 = sst [smem:[#allocation39_spill]] %s2225_s8 }
   0x9   :  { %2254 = sst [smem:[#allocation40_spill]] %s2226_s9 }
   0xa   :  { %2255 = sst [smem:[#allocation41_spill]] %s2227_s10 }
   0xb   :  { %2256 = sst [smem:[#allocation42_spill]] %s2228_s11 }
   0xc   :  { %16 = vsyncpa [#allocation6], 0 }
   0xd   :  { %18 = vsyncpa [#allocation6 + $0x1], 0 }
   0xe   :  { %19 = vsyncpa [#allocation9], 0 }
   0xf   :  { %21 = vsyncpa [#allocation9 + $0x1], 0 }
  0x10   :  { %22 = vsyncpa [#allocation12], 0 }
  0x11   :  { %23 = vsyncpa [#allocation15], 0 }
  0x12   :  { %24 = vsyncpa [#allocation7], 0 }
  0x13   :  { %26 = vsyncpa [#allocation7 + $0x1], 0  ;;  %s1875_s17 = smov 0   ;;  %s1877_s18 = smov 0  }
  0x14   :  { %s1879_s19 = smov 0   ;;  %s1881_s20 = smov 0  }
  0x15   :  { %s1883_s21 = smov 0   ;;  %s1885_s22 = smov 0  }
  0x16   :  { %s1887_s23 = smov 0   ;;  %s1889_s24 = smov 0  }
  0x17   :  { %s1891_s25 = smov 0   ;;  %s1893_s26 = smov 0  }
  0x18   :  { %s1895_s27 = smov 0  }
  0x19 LB: > { %2257 = sst [smem:[#allocation23_spill]] %s1771_s20  ;;  %s1931_s28 = sadd.s32 4294967295, %s1799_s27   ;;  %s1799_s27 = sphi %s1895_s27, %s32_s27   ;;  %s1795_s26 = sphi %s1893_s26, %s2300_s26   ;;  %s1791_s25 = sphi %s1891_s25, %s2308_s25   ;;  %s1787_s24 = sphi %s1889_s24, %s2298_s24   ;;  %s1783_s23 = sphi %s1887_s23, %s2307_s23   ;;  %s1779_s22 = sphi %s1885_s22, %s2306_s22   ;;  %s1775_s21 = sphi %s1883_s21, %s2305_s21   ;;  %s1771_s20 = sphi %s1881_s20, %s2304_s20   ;;  %s1767_s19 = sphi %s1879_s19, %s2303_s19   ;;  %s1763_s18 = sphi %s1877_s18, %s2302_s18   ;;  %s1759_s17 = sphi %s1875_s17, %s2301_s17  }
  0x1a   : > { %2258 = sst [smem:[#allocation24_spill]] %s1783_s23  ;;  %p1178_p0 = scmp.ge.s32.totalorder %s1799_s27, 1 }
  0x1b   : > { %2259 = sst [smem:[#allocation25_spill]] %s1787_s24  ;;  %p67_p1 = scmp.eq.s32.totalorder %s1931_s28, 0 }
  0x1c   : > { %2260 = sst [smem:[#allocation26_spill]] %s1795_s26  ;;  %p325_p2 = scmp.lt.s32.totalorder %s1799_s27, 5 }
  0x1d   : > { %s2261_s3 = sld [smem:[#allocation34_spill]]  ;;  %s1801_s14 = smov [#allocation11]  }
  0x1e   : > { %p1939_p3 = pnand %p1178_p0, %p325_p2  ;;  %s338_s15 = sshll.u32 %s1801_s14, 4  ;;  %s339_s15 = int_to_ptr.vmem [resolvable:$true] %s338_s15 }
  0x1f   : > { %s2264_s5 = sld [smem:[#allocation36_spill]]  ;;  %s2230_s10 = smov 64  }
  0x20   : > { %p1296_p4 = pneg %p1939_p3  ;;  %s2232_s14 = smov 4  }
  0x21   : > { %s1804_s11 = smov [#allocation14]   ;;  %p61_p6 = scmp.eq.s32.totalorder %s1799_s27, 0 }
  0x22   : > { %p1947_p5 = pnand %p1296_p4, %p67_p1  ;;  %s366_s24 = sshll.u32 %s1804_s11, 4  ;;  %s367_s24 = int_to_ptr.vmem [resolvable:$true] %s366_s24 }
  0x23   : > { %s336_s12 = sshll.u32 %s2261_s3, 4  ;;  %p86_p7 = scmp.ne.s32.totalorder %s1767_s19, %s1763_s18  ;;  %s337_s12 = int_to_ptr.hbm [resolvable:$true] %s336_s12 }
  0x24   : > { %1299 = dma.hbm_to_vmem [thread:$0]  (!%p1947_p5), %s337_s12, 256, %s339_s15, [#allocation12], %s2230_s10, %s2230_s10, %s2232_s14  }
  0x25   : > { %s364_s3 = sshll.u32 %s2264_s5, 4  ;;  %p92_p8 = scmp.ne.s32.totalorder %s1763_s18, %s1759_s17  ;;  %s365_s3 = int_to_ptr.hbm [resolvable:$true] %s364_s3 }
  0x26   : > { %1305 = dma.hbm_to_vmem [thread:$0]  (!%p1947_p5), %s365_s3, 256, %s367_s24, [#allocation15], %s2230_s10, %s2230_s10, %s2232_s14  }
  0x27   : > { %p2236_p9 = scmp.lt.s32.totalorder %s1799_s27, 4  ;;  %s427_s29 = sand.u32 1, %s1799_s27  }
  0x28   : > { %p88_p10 = por %p86_p7, %p61_p6  ;;  %p1975_p11 = por %p92_p8, %p67_p1 }
  0x29   : > { %s429_s11 = sand.u32 1, %s1767_s19   ;;  %s1260_s15 = sshll.u32 %s1795_s26, 4 }
  0x2a   : > { %s2265_s30 = scalar_select %p1975_p11, 1, 0 }
  0x2b   : > { %s1187_s12 = sshll.u32 %s429_s11, 4  ;;  %s2267_s1 = sld [smem:[#allocation32_spill]] }
  0x2c   : > { %2266 = sst [smem:[#allocation27_spill]] %s2265_s30  ;;  %s431_s10 = scalar_lea.vmem [#allocation8], %s1187_s12 }
  0x2d   : > { %s439_s17 = sshll.u32 %s431_s10, 4  ;;  %p1986_p12 = pnand %p2236_p9, %p88_p10  ;;  %s440_s17 = int_to_ptr.vmem [resolvable:$true] %s439_s17 }
  0x2e   : > { %s2269_s2 = sld [smem:[#allocation33_spill]]  ;;  %s1993_s23 = scalar_lea.sflag [#allocation9], %s427_s29 }
  0x2f   : > { %s2234_s5 = smov 128   ;;  %s2235_s7 = smov 8  }
  0x30   : > { %s453_s8 = scalar_lea.vmem [#allocation10], %s1187_s12  ;;  %s2270_s4 = sld [smem:[#allocation35_spill]] }
  0x31   : > { %s436_s3 = scalar_lea.hbm %s2267_s1, %s1260_s15  ;;  %s2004_s9 = sshll.u32 %s453_s8, 4  ;;  %s462_s9 = int_to_ptr.vmem [resolvable:$true] %s2004_s9 }
  0x32   : > { %s437_s24 = sshll.u32 %s436_s3, 4  ;;  %s2271_s6 = sld [smem:[#allocation37_spill]]  ;;  %s438_s24 = int_to_ptr.hbm [resolvable:$true] %s437_s24 }
  0x33   : > { %1315 = dma.hbm_to_vmem [thread:$0]  (!%p1986_p12), %s438_s24, 256, %s440_s17, %s1993_s23, %s2234_s5, %s2234_s5, %s2235_s7  }
  0x34   : > { %s458_s11 = scalar_lea.hbm %s2269_s2, %s1260_s15  ;;  %s1807_s24 = smov [#allocation13]  }
  0x35   : > { %s459_s3 = sshll.u32 %s458_s11, 4  ;;  %s352_s17 = sshll.u32 %s1807_s24, 4  ;;  %s2002_s3 = int_to_ptr.hbm [resolvable:$true] %s459_s3  ;;  %s353_s17 = int_to_ptr.vmem [resolvable:$true] %s352_s17 }
  0x36   : > { %s350_s1 = sshll.u32 %s2270_s4, 4  ;;  %s2272_s8 = smov 4   ;;  %s351_s1 = int_to_ptr.hbm [resolvable:$true] %s350_s1 }
  0x37   : > { %s2273_s7 = smov 64   ;;  %s1808_s29 = smov [#allocation16]  }
  0x38   : > { %s378_s12 = sshll.u32 %s2271_s6, 4  ;;  %s380_s15 = sshll.u32 %s1808_s29, 4  ;;  %s379_s12 = int_to_ptr.hbm [resolvable:$true] %s378_s12  ;;  %s381_s15 = int_to_ptr.vmem [resolvable:$true] %s380_s15 }
  0x39   : > { %1302 = dma.hbm_to_vmem [thread:$0]  (!%p1947_p5), %s351_s1, 256, %s353_s17, [#allocation12], %s2273_s7, %s2273_s7, %s2272_s8  }
  0x3a   : > { %1308 = dma.hbm_to_vmem [thread:$0]  (!%p1947_p5), %s379_s12, 256, %s381_s15, [#allocation15], %s2273_s7, %s2273_s7, %s2272_s8  }
  0x3b   : > { %s1177_s5 = sadd.s32 4294967294, %s1799_s27   ;;  %s41_s24 = sadd.s32 1, %s1791_s25 }
  0x3c   : > { %p42_p13 = scmp.ge.s32.totalorder %s41_s24, 2  ;;  %s44_s11 = sadd.s32 1, %s1795_s26 }
  0x3d   : > { %s53_s10 = sadd.s32 1, %s1779_s22  ;;  %p60_p0 = scmp.ne.s32.totalorder %s1779_s22, %s1775_s21 }
  0x3e   : > { %s2310_s24 = smov (%p42_p13, %s41_s24), 0  ;;  %s2312_s11 = smov (!%p42_p13, %s44_s11), %s1795_s26 }
  0x3f   : > { %2274 = sst [smem:[#allocation28_spill]] %s2310_s24  ;;  %s49_s1 = ssub.s32 %s1791_s25, %s2310_s24 }
  0x40   : > { %p2035_p2 = por %p61_p6, %p60_p0  ;;  %p46_p4 = scmp.ge.s32.totalorder %s2312_s11, 2 }
  0x41   : > { %p66_p5 = scmp.ne.s32.totalorder %s1775_s21, %s1771_s20  ;;  %p312_p7 = scmp.eq.s32.totalorder %s1931_s28, 3 }
  0x42   : > { %p318_p8 = scmp.eq.s32.totalorder %s1177_s5, 3  ;;  %s2314_s11 = smov (%p46_p4, %s2312_s11), 0 }
  0x43   : > { %2276 = sst [smem:[#allocation29_spill]] %s2314_s11  ;;  %p2046_p10 = por %p67_p1, %p66_p5 }
  0x44   : > { %p2050_p13 = por %p312_p7, %p60_p0  ;;  %s48_s12 = ssub.s32 %s1795_s26, %s2314_s11 }
  0x45   : > { %p2056_p6 = por %p318_p8, %p66_p5  ;;  %s50_s29 = sor.u32 %s49_s1, %s48_s12 }
  0x46   : > { %s2278_s17 = scalar_select %p2050_p13, 1, 0 }
  0x47   : > { %s2280_s8 = scalar_select %p2056_p6, 1, 0 }
  0x48   : > { %2279 = sst [smem:[#allocation30_spill]] %s2278_s17  ;;  %p77_p4 = scmp.eq.s32.totalorder %s48_s12, 0 }
  0x49   : > { %2281 = sst [smem:[#allocation31_spill]] %s2280_s8  ;;  %p51_p9 = scmp.eq.s32.totalorder %s50_s29, 0 }
  0x4a   : > { %s406_s15 = sand.u32 1, %s1779_s22   ;;  %s2282_s5 = sadd.s32 1, %s1767_s19 }
  0x4b   : > { %s2064_s2 = scalar_select %p77_p4, %s1767_s19, %s2282_s5  }
  0x4c   : > { %s2067_s4 = scalar_select %p51_p9, %s1779_s22, %s53_s10  }
  0x4d   : > { %s1184_s6 = sshll.u32 %s406_s15, 3  ;;  %s1185_s11 = sshll.u32 %s1795_s26, 1 }
  0x4e   : > { %s414_s24 = sadd.s32 %s1791_s25, %s1185_s11  ;;  %s410_s20 = scalar_lea.vmem [#allocation5], %s1184_s6 }
  0x4f   : > { %s420_s17 = sshll.u32 %s410_s20, 4  ;;  %s1186_s30 = sshll.u32 %s414_s24, 3  ;;  %s421_s17 = int_to_ptr.vmem [resolvable:$true] %s420_s17 }
  0x50   : > { %s416_s12 = scalar_lea.hbm %s2217_s0, %s1186_s30  ;;  %p2283_p0 = scmp.lt.s32.totalorder %s1799_s27, 4 }
  0x51   : > { %s418_s29 = sshll.u32 %s416_s12, 4  ;;  %s407_s5 = scalar_lea.sflag [#allocation6], %s406_s15  ;;  %s419_s29 = int_to_ptr.hbm [resolvable:$true] %s418_s29 }
  0x52   : > { %p1310_p5 = pnand %p2283_p0, %p2035_p2  ;;  %s2284_s10 = smov 8  }
  0x53   : > { %s2285_s26 = smov 128   ;;  %473 = sbr.rel (%p1939_p3) target bundleno = 1183 (0x49f), region = 64 }
  0x54   : > { %1312 = dma.hbm_to_vmem [thread:$0]  (!%p1310_p5), %s419_s29, 128, %s421_s17, %s407_s5  }
  0x55   : > { %1318 = dma.hbm_to_vmem [thread:$0]  (!%p1986_p12), %s2002_s3, 256, %s462_s9, %s1993_s23, %s2285_s26, %s2285_s26, %s2284_s10  }
  0x56   : > { %s2089_s6 = sand.u32 (!%p1939_p3), 1, %s1775_s21  }
  0x57   : > { %s1194_s20 = sshll.u32 (!%p1939_p3), %s2089_s6, 3  ;;  %s476_s30 = scalar_lea.sflag (!%p1939_p3), [#allocation6], %s2089_s6 }
  0x58   : > { %s2093_s24 = scalar_lea.vmem [#allocation5], %s1194_s20 }
  0x59   : > { %1738 = dma.done.wait (%p2046_p10), %s476_s30, 128  }
  0x5a   : > { %1740 = vsyncadd (%p2046_p10), %s476_s30, 4294967168  ;;  %s485_s26 = sand.u32 1, %s1931_s28   ;;  %s487_s13 = sand.u32 1, %s1763_s18  }
  0x5b   : > { %s1195_s14 = sshll.u32 %s487_s13, 4  ;;  %s486_s3 = scalar_lea.sflag [#allocation9], %s485_s26 }
  0x5c   : > { %s489_s9 = scalar_lea.vmem [#allocation8], %s1195_s14 }
  0x5d   : > { %1742 = dma.done.wait (%p1975_p11), %s486_s3, 512  }
  0x5e   : > { %1744 = vsyncadd (%p1975_p11), %s486_s3, 4294966784  ;;  %s499_s11 = scalar_lea.vmem [#allocation10], %s1195_s14 }
  0x5f   : > { %1746 = dma.done.wait (%p67_p1), [#allocation12], 512  }
  0x60   : > { %1748 = vsyncadd (%p67_p1), [#allocation12], 4294966784 }
  0x61   : > { %1750 = dma.done.wait (%p67_p1), [#allocation15], 512  }
  0x62   : > { %1752 = vsyncadd (%p67_p1), [#allocation15], 4294966784  ;;  %s2113_s16 = scalar_lea.vmem [#allocation17], %s1194_s20  ;;  %s2287_s7 = sld [smem:[#allocation24_spill]] }
  0x68   : > { %p1202_p3 = scmp.ne.s32.totalorder %s2287_s7, 0 }
  0x69   : > { %s2288_s8 = sld [smem:[#allocation39_spill]] (!%p1202_p3) }
  0x6a   : > { %573 = sbr.rel (%p1202_p3) target bundleno = 259 (0x103), region = 96  ;;  %s2289_s12 = sld [smem:[#allocation40_spill]] (!%p1202_p3) }
  0x6f   : > { %v1263_v0 = vld [vmem:[#allocation13 + $0x8] sm:$0xff]  ;;  %v1265_v1 = vld [vmem:[#allocation14 + $0x8] sm:$0xff]  ;;  %v1262_v2 = vld [vmem:[#allocation13] sm:$0xff]  ;;  %vm600_vm0 = vcmask 261120   ;;  %vm657_vm1 = vcmask 257024  }
  0x70   : > { %v1264_v3 = vld [vmem:[#allocation14] sm:$0xff]  ;;  %v575_v5 = vld [vmem:[%s489_s9 + $0x8] sm:$0xff]  ;;  %610 = vmatpush.bf16.msra.mxu0 %v1263_v0  ;;  %647 = vmatpush.bf16.msra.mxu1 %v1265_v1 }
  0x71   : > { %v574_v4 = vld [vmem:[%s489_s9] sm:$0xff]  ;;  %v578_v7 = vld [vmem:[%s499_s11 + $0x8] sm:$0xff] }
  0x72   : > { %v577_v6 = vld [vmem:[%s499_s11] sm:$0xff]  ;;  %v576_v8 = vpack.c.bf16 %v575_v5, %v574_v4  ;;  %v1435_v10 = vld [vmem:[%s2288_s8] ss:$0 sm:$0xff] }
  0x73   : > { %v579_v9 = vpack.c.bf16 %v578_v7, %v577_v6  ;;  %v1436_v11 = vld [vmem:[%s2289_s12] ss:$0 sm:$0xff] }
  0x74   : > { %611 = vmatpush.bf16.msra.mxu0 %v1262_v2  ;;  %648 = vmatpush.bf16.msra.mxu1 %v1264_v3 }
  0x77   : > { %1211 = vmatmul.msk.bf16.vlgmr.msra.gmra.mxu0 %vm600_vm0, %v576_v8  ;;  %1220 = vmatmul.msk.bf16.vlgmr.msra.gmra.mxu1 %vm600_vm0, %v579_v9 }
  0xf4   : > { %v613_v12 = vpop.f32.mrf.mxu0  ;;  %v650_v13 = vpop.f32.mrf.mxu1 }
  0xf5   : > { %v614_v14 = vadd.f32 %v1435_v10, %v613_v12  ;;  %v651_v15 = vadd.f32 %v1436_v11, %v650_v13 }
  0xf7   : > { %v655_v16 = vpack.c.bf16 %v614_v14, %v614_v14  ;;  %v660_v17 = vpack.c.bf16 %v651_v15, %v651_v15 }
  0xf9   : > { %658 = vst.msk [vmem:[#allocation2] sm:$0xf] %vm657_vm1, %v655_v16 }
  0xfa   : > { %662 = vst.msk [vmem:[#allocation3] sm:$0xf] %vm657_vm1, %v660_v17 }
  0xfc   : > { %v615_v18 = vpop.f32.mrf.mxu0  ;;  %v652_v19 = vpop.f32.mrf.mxu1 }
  0xfd   : > { %v616_v20 = vadd.f32 %v1435_v10, %v615_v18  ;;  %v653_v21 = vadd.f32 %v1436_v11, %v652_v19 }
  0xff   : > { %v656_v22 = vpack.c.bf16 %v616_v20, %v616_v20  ;;  %v661_v23 = vpack.c.bf16 %v653_v21, %v653_v21 }
 0x101   : > { %659 = vst.msk [vmem:[#allocation2 + $0x4] sm:$0xf] %vm657_vm1, %v656_v22 }
 0x102   : > { %663 = vst.msk [vmem:[#allocation3 + $0x4] sm:$0xf] %vm657_vm1, %v661_v23 }
 0x103 PF: > { %v1267_v24 = vld [vmem:[#allocation11 + $0x8] sm:$0xff]  ;;  %v1266_v25 = vld [vmem:[#allocation11] sm:$0xff]  ;;  %v664_v26 = vld [vmem:[%s2093_s24] sm:$0xff]  ;;  %vm686_vm2 = vcmask 261120   ;;  %vm714_vm3 = vcmask 64512   ;;  %s1809_s29 = smov 112  }
 0x104   : > { %696 = vmatpush.bf16.msra.mxu0 %v1267_v24  ;;  %v665_v27 = vpack.c.bf16 %v664_v26, %v664_v26  ;;  %s1810_s5 = smov 104   ;;  %s1811_s10 = smov 120   ;;  %vm734_vm4 = vcmask 130048   ;;  %vm831_vm5 = vcmask 130112   ;;  %vm891_vm6 = vcmask 195712  }
 0x105   : > { %s2290_s24 = sld [smem:[#allocation38_spill]]  ;;  %s1812_s23 = smov 8   ;;  %vm951_vm7 = vcmask 261312  }
 0x106   : > { %s1813_s26 = smov 16   ;;  %s1814_s13 = smov 24  }
 0x107   : > { %s2291_s14 = sld [smem:[#allocation25_spill]]  ;;  %s993_s30 = scalar_lea.sflag [#allocation7], %s2089_s6 }
 0x108   : > { %697 = vmatpush.bf16.msra.mxu0 %v1266_v25  ;;  %v1268_v28 = vld [vmem:[#allocation2] sm:$0xff]  ;;  %s2292_s3 = sld [smem:[#allocation24_spill]] }
 0x109   : > { %v719_v29 = vsel %vm714_vm3, %v1268_v28, 0  ;;  %835 = vrot.lane.b32.xlu2 %v1268_v28, %s1809_s29  ;;  %895 = vrot.lane.b32.xlu1 %v1268_v28, %s1810_s5  ;;  %v1269_v50 = vld [vmem:[#allocation3] sm:$0xff]  ;;  %s2294_s15 = sld [smem:[#allocation42_spill]] }
 0x10a   : > { %728 = vmatpush.bf16.xpose.msra.mxu1 %v719_v29  ;;  %775 = vrot.lane.b32.xlu0 %v1268_v28, %s1811_s10 }
 0x10b   : > { %1229 = vmatmul.msk.bf16.vlgmr.msra.gmra.mxu0 %vm686_vm2, %v665_v27  ;;  %v1437_v30 = vld [vmem:[%s2290_s24] ss:$0 sm:$0xff]  ;;  %761 = vmatpush.bf16.msra.mxu2 %v1269_v50 }
 0x10d   : > { %s1256_s9 = sshll.u32 %s2291_s14, 1 }
 0x10e   : > { %s1003_s11 = sadd.s32 %s2292_s3, %s1256_s9 }
 0x10f   : > { %s1257_s28 = sshll.u32 %s1003_s11, 3  ;;  %s1685_s14 = scalar_lea.hbm %s2294_s15, 32 }
 0x110   : > { %s1005_s1 = scalar_lea.hbm %s2294_s15, %s1257_s28 }
 0x111   : > { %s1009_s20 = sshll.u32 %s1005_s1, 4  ;;  %s1010_s20 = int_to_ptr.hbm [resolvable:$true] %s1009_s20 }
 0x112   : > { %s1679_s24 = sshra.s32 %s1010_s20, 4  ;;  %s1680_s24 = int_to_ptr.hbm [resolvable:$true] %s1679_s24 }
 0x113   : > { %p1686_p12 = scmp.lt.s32.totalorder %s1680_s24, %s2294_s15 }
 0x163   : > { %v836_v38 = vpop.permute.xlu2 %835 }
 0x164   : > { %v841_v39 = vsel %vm714_vm3, %v836_v38, 0 }
 0x165   : > { %850 = vmatpush.bf16.xpose.msrb.mxu0 %v841_v39 }
 0x17b   : > { %v896_v43 = vpop.permute.xlu1 %895 }
 0x17c   : > { %v776_v40 = vpop.permute.xlu0 %775  ;;  %v901_v44 = vsel %vm714_vm3, %v896_v43, 0 }
 0x17d   : > { %v781_v41 = vsel %vm714_vm3, %v776_v40, 0 }
 0x17e   : > { %790 = vmatpush.bf16.xpose.msra.mxu3 %v781_v41 }
 0x186   : > { %910 = vmatpush.bf16.xpose.msrb.mxu3 %v901_v44  ;;  %v1271_v44 = vld [vmem:[#allocation16 + $0x8] sm:$0xff] }
 0x187   : > { %984 = vmatpush.bf16.msra.mxu0 %v1271_v44 }
 0x188   : > { %v699_v31 = vpop.f32.mrf.mxu0 }
 0x189   : > { %v700_v32 = vadd.f32 %v1437_v30, %v699_v31 }
 0x18b   : > { %v703_v33 = vmul.f32 0.35355338, %v700_v32 }
 0x18d   : > { %v704_v34 = vpack.c.bf16 %v703_v33, %v703_v33 }
 0x18f   : > { %v771_v35 = vunpack.c.l.b16 %v704_v34  ;;  %1234 = vmatmul.msk.bf16.vlgmr.msra.gmra.mxu1 %vm714_vm3, %v704_v34 }
 0x190   : > { %v701_v36 = vpop.f32.mrf.mxu0 }
 0x191   : > { %v772_v37 = vpack.c.b16 %v771_v35, %v771_v35 }
 0x193   : > { %833 = vrot.lane.b32.xlu2 %v772_v37, %s1809_s29  ;;  %893 = vrot.lane.b32.xlu1 %v772_v37, %s1810_s5 }
 0x194   : > { %773 = vrot.lane.b32.xlu0 %v772_v37, %s1811_s10 }
 0x19b   : > { %806 = vrot.lane.b32.xlu2 %v1269_v50, %s1811_s10  ;;  %s1007_s10 = sshll.u32 %s2113_s16, 4  ;;  %s1008_s10 = int_to_ptr.vmem [resolvable:$true] %s1007_s10 }
 0x1ed   : > { %v834_v42 = vpop.permute.xlu2 %833 }
 0x1ee   : > { %1242 = vmatmul.msk.bf16.vlgmr.msrb.gmra.mxu0 %vm714_vm3, %v834_v42 }
 0x1f5   : > { %v807_v1 = vpop.permute.xlu2 %806 }
 0x1f6   : > { %819 = vmatpush.bf16.msrb.mxu2 %v807_v1 }
 0x205   : > { %v894_v49 = vpop.permute.xlu1 %893 }
 0x206   : > { %v774_v45 = vpop.permute.xlu0 %773 }
 0x207   : > { %1240 = vmatmul.msk.bf16.vlgmr.msra.gmra.mxu3 %vm714_vm3, %v774_v45  ;;  %v1270_v45 = vld [vmem:[#allocation16] sm:$0xff] }
 0x208   : > { %985 = vmatpush.bf16.msra.mxu0 %v1270_v45 }
 0x20c   : > { %v730_v46 = vpop.f32.mrf.mxu1 }
 0x20d   : > { %v735_v47 = vsel %vm734_vm4, %v730_v46, -inf }
 0x20e   : > { %736 = vmax.xlane.f32.xlu0 %v735_v47 }
 0x214   : > { %v732_v48 = vpop.f32.mrf.mxu1 }
 0x217   : > { %1244 = vmatmul.msk.bf16.vlgmr.msrb.gmra.mxu3 %vm714_vm3, %v894_v49 }
 0x26b   : > { %v852_v51 = vpop.f32.mrf.mxu0 }
 0x26c   : > { %v856_v52 = vsel %vm734_vm4, %v852_v51, -inf }
 0x26d   : > { %857 = vmax.xlane.f32.xlu0 %v856_v52 }
 0x273   : > { %v854_v53 = vpop.f32.mrf.mxu0 }
 0x281   : > { %v737_v54 = vpop.xlane.xlu0 %736 }
 0x282   : > { %v738_v55 = vsub.f32 %v730_v46, %v737_v54 }
 0x284   : > { %v739_v56 = vmul.f32 1.442695, %v738_v55 }
 0x286   : > { %1439 = vpow2.f32 %v739_v56 }
 0x28a   : > { %v792_v57 = vpop.f32.mrf.mxu3 }
 0x28b   : > { %v796_v58 = vsel %vm734_vm4, %v792_v57, -inf }
 0x28c   : > { %v1440_v59 = vpop.eup %1439  ;;  %797 = vmax.xlane.f32.xlu1 %v796_v58 }
 0x28d   : > { %v744_v60 = vpack.c.bf16 %v1440_v59, %v1440_v59  ;;  %v741_v2 = vsel %vm734_vm4, %v1440_v59, 0.0 }
 0x28f   : > { %1239 = vmatmul.msk.bf16.vlgmr.msra.gmra.mxu2 %vm734_vm4, %v744_v60 }
 0x292   : > { %v794_v61 = vpop.f32.mrf.mxu3 }
 0x29a   : > { %v912_v62 = vpop.f32.mrf.mxu3 }
 0x29b   : > { %v916_v63 = vsel %vm734_vm4, %v912_v62, -inf }
 0x29c   : > { %917 = vmax.xlane.f32.xlu2 %v916_v63 }
 0x2a2   : > { %v914_v0 = vpop.f32.mrf.mxu3 }
 0x2a5   : > { %926 = vrot.lane.b32.xlu1 %v1269_v50, %s1810_s5  ;;  %s2295_s5 = sld [smem:[#allocation41_spill]] }
 0x2b4   : > { %866 = vrot.lane.b32.xlu2 %v1269_v50, %s1809_s29  ;;  %v1438_v50 = vld [vmem:[%s2295_s5] ss:$0 sm:$0xff] }
 0x2cf   : > { %742 = vadd.xlane.f32.xlu1 %v741_v2 }
 0x2e0   : > { %v858_v3 = vpop.xlane.xlu0 %857 }
 0x2e1   : > { %v859_v4 = vsub.f32 %v852_v51, %v858_v3 }
 0x2e3   : > { %v860_v5 = vmul.f32 1.442695, %v859_v4 }
 0x2e5   : > { %1441 = vpow2.f32 %v860_v5 }
 0x2eb   : > { %v1442_v6 = vpop.eup %1441 }
 0x2ec   : > { %v862_v7 = vsel %vm734_vm4, %v1442_v6, 0.0  ;;  %v865_v20 = vpack.c.bf16 %v1442_v6, %v1442_v6 }
 0x2ed   : > { %863 = vadd.xlane.f32.xlu0 %v862_v7 }
 0x2ff   : > { %v798_v8 = vpop.xlane.xlu1 %797 }
 0x300   : > { %v799_v9 = vsub.f32 %v792_v57, %v798_v8 }
 0x302   : > { %v800_v10 = vmul.f32 1.442695, %v799_v9 }
 0x304   : > { %1443 = vpow2.f32 %v800_v10 }
 0x30a   : > { %v1444_v11 = vpop.eup %1443 }
 0x30b   : > { %v802_v12 = vsel %vm734_vm4, %v1444_v11, 0.0  ;;  %v805_v13 = vpack.c.bf16 %v1444_v11, %v1444_v11 }
 0x30c   : > { %803 = vadd.xlane.f32.xlu0 %v802_v12 }
 0x30d   : > { %1241 = vmatmul.msk.bf16.vlgmr.msrb.gmra.mxu2 %vm734_vm4, %v805_v13 }
 0x30f   : > { %v918_v14 = vpop.xlane.xlu2 %917 }
 0x310   : > { %v919_v15 = vsub.f32 %v912_v62, %v918_v14 }
 0x312   : > { %v920_v16 = vmul.f32 1.442695, %v919_v15  ;;  %v763_v17 = vpop.f32.mrf.mxu2 }
 0x314   : > { %1445 = vpow2.f32 %v920_v16 }
 0x317   : > { %v867_v18 = vpop.permute.xlu2 %866  ;;  %v927_v19 = vpop.permute.xlu1 %926 }
 0x318   : > { %879 = vmatpush.bf16.msrb.mxu1 %v867_v18  ;;  %939 = vmatpush.bf16.msra.mxu2 %v927_v19 }
 0x31a   : > { %v1446_v21 = vpop.eup %1445  ;;  %v765_v22 = vpop.f32.mrf.mxu2 }
 0x31b   : > { %v925_v23 = vpack.c.bf16 %v1446_v21, %v1446_v21  ;;  %1243 = vmatmul.msk.bf16.vlgmr.msrb.gmra.mxu1 %vm734_vm4, %v865_v20  ;;  %v922_v24 = vsel %vm734_vm4, %v1446_v21, 0.0 }
 0x31c   : > { %923 = vadd.xlane.f32.xlu0 %v922_v24 }
 0x31d   : > { %1245 = vmatmul.msk.bf16.vlgmr.msra.gmra.mxu2 %vm734_vm4, %v925_v23 }
 0x342   : > { %v743_v25 = vpop.xlane.xlu1 %742 }
 0x343   : > { %1447 = vrcp.f32 %v743_v25 }
 0x349   : > { %v1448_v26 = vpop.eup %1447 }
 0x34a   : > { %v768_v27 = vmul.f32 %v1448_v26, %v763_v17 }
 0x34c   : > { %769 = vst.msk [vmem:[#allocation4] sm:$0xff] %vm714_vm3, %v768_v27 }
 0x360   : > { %v864_v28 = vpop.xlane.xlu0 %863 }
 0x37f   : > { %v804_v29 = vpop.xlane.xlu0 %803 }
 0x380   : > { %1449 = vrcp.f32 %v804_v29 }
 0x381   : > { %1451 = vrcp.f32 %v864_v28 }
 0x386   : > { %v1450_v30 = vpop.eup %1449 }
 0x387   : > { %v1452_v34 = vpop.eup %1451 }
 0x38f   : > { %v924_v33 = vpop.xlane.xlu0 %923 }
 0x390   : > { %v821_v31 = vpop.f32.mrf.mxu2  ;;  %1453 = vrcp.f32 %v924_v33 }
 0x391   : > { %v826_v32 = vmul.f32 %v1450_v30, %v821_v31 }
 0x393   : > { %828 = vrot.lane.b32.xlu2 %v826_v32, %s1812_s23  ;;  %s1681_s23 = scalar_lea.hbm %s1680_s24, 8 }
 0x394   : > { %p1682_p1 = scmp.ne.s32.totalorder %s1680_s24, %s1681_s23  ;;  %p1687_p2 = scmp.lt.s32.totalorder %s1685_s14, %s1681_s23 }
 0x396   : > { %v1454_v38 = vpop.eup %1453  ;;  %p1683_p9 = pnand %p1682_p1, %p2050_p13  ;;  %p1688_p7 = por %p1687_p2, %p1686_p12 }
 0x398   : > { %v823_v35 = vpop.f32.mrf.mxu2  ;;  %v881_v36 = vpop.f32.mrf.mxu1  ;;  %p1684_p11 = pneg %p1683_p9 }
 0x399   : > { %v886_v37 = vmul.f32 %v1452_v34, %v881_v36 }
 0x39a   : > { %p1689_p8 = pnand %p1688_p7, %p1684_p11 }
 0x39b   : > { %888 = vrot.lane.b32.xlu0 %v886_v37, %s1813_s26 }
 0x3a0   : > { %v883_v39 = vpop.f32.mrf.mxu1  ;;  %v941_v40 = vpop.f32.mrf.mxu2 }
 0x3a1   : > { %v946_v41 = vmul.f32 %v1454_v38, %v941_v40 }
 0x3a3   : > { %948 = vrot.lane.b32.xlu2 %v946_v41, %s1814_s13 }
 0x3a8   : > { %v943_v42 = vpop.f32.mrf.mxu2 }
 0x3ed   : > { %v829_v43 = vpop.permute.xlu2 %828 }
 0x3ee   : > { %832 = vst.msk [vmem:[#allocation4] sm:$0xff] %vm831_vm5, %v829_v43 }
 0x3fd   : > { %v949_v47 = vpop.permute.xlu2 %948 }
 0x40d   : > { %v889_v46 = vpop.permute.xlu0 %888 }
 0x40e   : > { %892 = vst.msk [vmem:[#allocation4] sm:$0xff] %vm891_vm6, %v889_v46 }
 0x40f   : > { %952 = vst.msk [vmem:[#allocation4] sm:$0xff] %vm951_vm7, %v949_v47 }
 0x416   : > { %v953_v48 = vld [vmem:[#allocation4] sm:$0xff] }
 0x417   : > { %v954_v49 = vpack.c.bf16 %v953_v48, %v953_v48 }
 0x419   : > { %1254 = vmatmul.msk.bf16.vlgmr.msra.gmra.mxu0 %vm686_vm2, %v954_v49 }
 0x496   : > { %v987_v51 = vpop.f32.mrf.mxu0 }
 0x497   : > { %v988_v52 = vadd.f32 %v1438_v50, %v987_v51 }
 0x499   : > { %991 = vst.msk [vmem:[%s2113_s16] sm:$0xff] %vm686_vm2, %v988_v52 }
 0x49a   : > { %1692 = shalt.err (!%p1689_p8)
}
 0x49b   : > { %1294 = dma.vmem_to_hbm [thread:$0]  (%p2050_p13), %s1008_s10, 128, %s1010_s20, %s993_s30  }
 0x49e   : > { %v989_v53 = vpop.f32.mrf.mxu0 }
 0x49f PF: > { %s2296_s6 = sld [smem:[#allocation23_spill]]  ;;  %p1332_p10 = scmp.ge.s32.totalorder %s1799_s27, 2 }
 0x4a1   : > { %p1320_p4 = pnand %p1332_p10, %p2056_p6 }
 0x4a3   : > { %p1321_p0 = pneg %p1320_p4 }
 0x4a5   : > { %s1021_s11 = sand.u32 1, %s2296_s6  }
 0x4a6   : > { %s1022_s28 = scalar_lea.sflag [#allocation7], %s1021_s11 }
 0x4a7   : > { %1754 = dma.done.wait (%p1321_p0), %s1022_s28, 128  }
 0x4a8   : > { %1756 = vsyncadd (%p1321_p0), %s1022_s28, 4294967168  ;;  %s32_s27 = sadd.s32 1, %s1799_s27   ;;  %s2298_s24 = sld [smem:[#allocation26_spill]] }
 0x4a9   : > { %p29_p5 = scmp.ge.s32.totalorder %s32_s27, 6   ;;  %s2299_s7 = sld [smem:[#allocation28_spill]] }
 0x4aa   : > { %s2300_s26 = sld [smem:[#allocation29_spill]]  ;;  %s2301_s17 = smov %s1763_s18 }
 0x4ab   : > { %s2302_s18 = smov %s1767_s19  ;;  %s2303_s19 = smov %s2064_s2 }
 0x4ac   : > { %s2304_s20 = smov %s1775_s21  ;;  %s2305_s21 = smov %s1779_s22 }
 0x4ad   : > { %s2306_s22 = smov %s2067_s4  ;;  %s2307_s23 = smov %s1791_s25 }
 0x4ae   :  { %31 = sbr.rel (!%p29_p5) target bundleno = 25 (0x19), region = 153 }
 0x4af   : > { %s2308_s25 = smov %s2299_s7 }
 0x4b3   :  { %1028 = vsyncpa [#allocation6], 1 }
 0x4b4   :  { %1030 = vsyncpa [#allocation6 + $0x1], 1 }
 0x4b5   :  { %1031 = vsyncpa [#allocation9], 1 }
 0x4b6   :  { %1033 = vsyncpa [#allocation9 + $0x1], 1 }
 0x4b7   :  { %1034 = vsyncpa [#allocation12], 1 }
 0x4b8   :  { %1035 = vsyncpa [#allocation15], 1 }
 0x4b9   :  { %1036 = vsyncpa [#allocation7], 1 }
 0x4ba   :  { %1038 = vsyncpa [#allocation7 + $0x1], 1 }

</bundles_post_ra>
